<compile_context>
chip_gen: v7x
topology: tpu7x:2x2x1
jax: 0.10.0
libtpu: 0.0.40
codegen_flags: <defaults>
</compile_context>

<pallas_src>
import functools
import math

import numpy as np
import jax
import jax.numpy as jnp
from jax.experimental import pallas as pl
from jax.experimental.pallas import tpu as pltpu


# --------------------------------------------------------------------------- kernels

def _kernel_take(idx_ref, tok_ref, wx_ref, x_ref, xp_ref, o_ref):
    # idx_ref : SMEM int32[B]  batch permutation (consumed by the index_maps only)
    # tok_ref : VMEM int32[L,1] source token for every output token (shuffle map)
    # wx_ref  : VMEM f32 [L,1]  weight of the direct row, per *source* token
    # x_ref   : VMEM (1,L,TD)   row b of x            (feature tile)
    # xp_ref  : VMEM (1,L,TD)   row index[b] of x     (batch perm done by DMA)
    del idx_ref
    wx = wx_ref[...]                                            # (L,1) f32
    xa = x_ref[0].astype(jnp.float32)                           # (L,TD)
    xb = xp_ref[0].astype(jnp.float32)
    sel = wx * xa + (1.0 - wx) * xb                             # f32 mix (VPU)
    tok = tok_ref[...][:, 0]                                    # (L,) int32
    out = jnp.take(sel, tok, axis=0, mode="clip")               # token shuffle (sublane gather)
    o_ref[...] = out[None].astype(o_ref.dtype)


def _kernel_onehot(idx_ref, g_ref, wx_ref, x_ref, xp_ref, o_ref):
    # Fallback only (used if the sublane-gather lowering is unavailable): shuffle as a
    # single-pass bf16 one-hot matmul on the otherwise-idle MXU, f32 accumulation.
    # TODO(synk): on v5e prefer a segment-slice fallback over the MXU path (197 TF/s part).
    del idx_ref
    wx = wx_ref[...]
    sel = wx * x_ref[0].astype(jnp.float32) + (1.0 - wx) * xp_ref[0].astype(jnp.float32)
    out = jnp.dot(g_ref[...], sel.astype(jnp.bfloat16),
                  preferred_element_type=jnp.float32)           # (L,TD)
    o_ref[...] = out[None].astype(o_ref.dtype)


# --------------------------------------------------------------------------- tiling helpers

def _vmem_capacity_bytes():
    try:
        cap = getattr(pltpu.get_tpu_info(), "vmem_capacity_bytes", None)
        if cap:
            return int(cap)
    except Exception:
        pass
    return 64 * 1024 * 1024  # conservative default: v7x per-TensorCore VMEM


def _choose_td(L, D, itemsize):
    """Largest 128-multiple feature tile that divides D and fits the VMEM budget."""
    cap = _vmem_capacity_bytes()
    budget = int(cap * 0.6)                 # headroom for constants / intermediates / compiler scratch
    per_col = 6 * L * max(int(itemsize), 4)  # 3 streams x 2 pipeline buffers per output column
    max_td = (budget // per_col) // 128 * 128
    if D % 128 != 0 or D <= max_td:
        return D                            # full-extent last dim (required if not 128-aligned)
    td = max(128, max_td)
    while D % td != 0:
        td -= 128
    return td


# --------------------------------------------------------------------------- pallas runner

def _run(idx, aux, wx, x, *, method, td):
    B, L, D = x.shape
    nd = pl.cdiv(D, td)
    itemsize = jnp.dtype(x.dtype).itemsize
    kernel = _kernel_take if method == "take" else _kernel_onehot

    const = lambda b, d, idx_ref: (0, 0)                # small constants: DMA'd once, reused
    row = lambda b, d, idx_ref: (b, 0, d)               # x[b], feature tile d
    # TODO(synk): for CutMix, restrict this partner-row stream to the box source-token
    # ranges (saves ~lam of the xp read) via prefetched range offsets in the index_map.
    prow = lambda b, d, idx_ref: (idx_ref[b], 0, d)     # x[index[b]] (DMA-level batch perm)

    cap = _vmem_capacity_bytes()
    need = (6 * L * td * itemsize                       # 3 streams x 2 pipeline buffers
            + aux.size * aux.dtype.itemsize * 2         # shuffle map / one-hot G
            + L * 128 * 4 * 2                           # wx padded to (L,128) lanes
            + (4 << 20))                                # slack for intermediates
    vmem_limit = int(min(cap * 0.9, max(need, 16 * 1024 * 1024)))

    grid_spec = pltpu.PrefetchScalarGridSpec(
        num_scalar_prefetch=1,                          # `index` lands in SMEM for the index_maps
        grid=(B, nd),
        in_specs=[
            pl.BlockSpec(aux.shape, const),             # tok_map (L,1) or one-hot G (L,L)
            pl.BlockSpec((L, 1), const),                # wx (f32)
            pl.BlockSpec((1, L, td), row),              # x[b]
            pl.BlockSpec((1, L, td), prow),             # x[index[b]]
        ],
        out_specs=pl.BlockSpec((1, L, td), row),
    )
    cost = pl.CostEstimate(
        flops=3 * B * L * D,                            # mul, mul, add per element
        transcendentals=0,
        bytes_accessed=3 * B * L * D * itemsize,        # two reads + one write
    )
    return pl.pallas_call(
        kernel,
        out_shape=jax.ShapeDtypeStruct((B, L, D), x.dtype),
        grid_spec=grid_spec,
        compiler_params=pltpu.CompilerParams(
            dimension_semantics=("parallel", "parallel"),  # shard (B, D-tiles) across v7x TCs
            vmem_limit_bytes=vmem_limit,
        ),
        cost_estimate=cost,
    )(idx, aux, wx, x, x)


_run_jit = jax.jit(_run, static_argnames=("method", "td"))


@functools.lru_cache(maxsize=None)
def _take_lowering_ok(B, L, D, td, dtype_name):
    """Cheap AOT lowering check for the sublane-gather path (no device traffic)."""
    try:
        _run_jit.lower(
            jax.ShapeDtypeStruct((B,), jnp.int32),
            jax.ShapeDtypeStruct((L, 1), jnp.int32),
            jax.ShapeDtypeStruct((L, 1), jnp.float32),
            jax.ShapeDtypeStruct((B, L, D), jnp.dtype(dtype_name)),
            method="take", td=td)
        return True
    except Exception:
        return False


# --------------------------------------------------------------------------- host wrapper

def shufflemix_pallas(x, *, alpha=1.0, num_seg=3, shuff=True,
                      mix_or_cut="CutMix", seed=0, token_gather="auto"):
    """x: (B, L, D). Returns (mixed_x, lam, index, aux). Host RNG matches the torch module."""
    B, L, D = x.shape
    rng = np.random.RandomState(seed)

    # ---- Shuffle: token gather map (contiguous segments in random order) ----
    if shuff in (True, "True") and int(num_seg) > 1:
        num_token = int(num_seg)
        token_len = math.ceil(L / (num_token - 1))
        lo = token_len // 4
        hi = max(token_len * 3 // 4, lo + 1)
        sx = int(rng.randint(lo, hi))
        tok_list = []
        for ii in rng.permutation(num_token):
            s1 = int(np.clip(sx + token_len * (ii - 1), 0, L))
            s2 = int(np.clip(sx + token_len * ii, 0, L))
            tok_list.extend(range(s1, s2))
        tok_map = np.asarray(tok_list, dtype=np.int32)
    else:
        tok_map = np.arange(L, dtype=np.int32)
    assert tok_map.shape[0] == L  # clipped segment boundaries always partition [0, L)

    # ---- Mix parameters (host RNG, as in the PyTorch module) ----
    lam0 = float(rng.beta(alpha, alpha))
    index = rng.permutation(B).astype(np.int32)
    if mix_or_cut == "CutMix":
        cut_len = int(L * (1.0 - lam0))
        cx = int(rng.randint(L))
        bbx1 = int(np.clip(cx - cut_len // 2, 0, L))
        bbx2 = int(np.clip(cx + cut_len // 2, 0, L))
        lam = 1.0 - (bbx2 - bbx1) / L
        mask_out = ((np.arange(L) >= bbx1) & (np.arange(L) < bbx2)).astype(np.float32)
        wp_src = np.zeros(L, np.float32)
        wp_src[tok_map] = mask_out        # box mask in output space -> source-token space
        wx_src = 1.0 - wp_src             # weights in {0,1} -> exact copy semantics
    elif mix_or_cut == "Mixup":
        lam, bbx1, bbx2 = lam0, None, None
        wx_src = np.full(L, lam0, np.float32)
    else:
        raise ValueError(f"unknown mix_or_cut: {mix_or_cut!r}")

    dtype_name = jnp.dtype(x.dtype).name
    itemsize = jnp.dtype(x.dtype).itemsize
    td = _choose_td(L, D, itemsize)

    if token_gather == "auto":
        method = "take" if _take_lowering_ok(B, L, D, td, dtype_name) else "onehot"
    else:
        method = token_gather

    wx_d = jnp.asarray(wx_src.reshape(L, 1), dtype=jnp.float32)   # mix weights stay f32
    idx_d = jnp.asarray(index, dtype=jnp.int32)                   # SMEM scalar prefetch
    if method == "take":
        aux_in = jnp.asarray(tok_map.reshape(L, 1), dtype=jnp.int32)
    else:
        g = np.zeros((L, L), dtype=np.float32)
        g[np.arange(L), tok_map] = 1.0
        aux_in = jnp.asarray(g, dtype=jnp.bfloat16)               # 0/1 exact in bf16

    out = _run_jit(idx_d, aux_in, wx_d, x, method=method, td=td)  # no per-call blocking

    aux = dict(tok_map=tok_map, bbx1=bbx1, bbx2=bbx2, index=index, gather=method, td=td)
    return out, lam, idx_d, aux


# --------------------------------------------------------------------------- demo / self-test

if __name__ == "__main__":
    key = jax.random.PRNGKey(0)
    B, L, D = 4, 16, 32
    x = jax.random.normal(key, (B, L, D), dtype=jnp.float32)
    x_np = np.asarray(x)

    # ---- CutMix branch (matches the PyTorch forward with MixOrCut='CutMix') ----
    out, lam, index, aux = shufflemix_pallas(
        x, alpha=1.0, num_seg=3, shuff=True, mix_or_cut="CutMix", seed=0)
    out = jax.block_until_ready(out)
    shuf = x_np[:, aux["tok_map"], :]
    ref = shuf.copy()
    ref[:, aux["bbx1"]:aux["bbx2"]] = shuf[aux["index"], aux["bbx1"]:aux["bbx2"]]
    if aux["gather"] == "take":
        np.testing.assert_allclose(np.asarray(out), ref, rtol=0.0, atol=0.0)
    else:  # bf16 one-hot fallback is not bit-exact for f32 data
        np.testing.assert_allclose(np.asarray(out), ref, rtol=5e-2, atol=5e-2)

    # ---- Mixup branch ----
    out_m, lam_m, index_m, aux_m = shufflemix_pallas(
        x, alpha=1.0, num_seg=3, shuff=True, mix_or_cut="Mixup", seed=1)
    out_m = jax.block_until_ready(out_m)
    shuf_m = x_np[:, aux_m["tok_map"], :]
    wxf = np.float32(lam_m)
    ref_m = wxf * shuf_m + (np.float32(1.0) - wxf) * shuf_m[aux_m["index"]]
    tol = 1e-6 if aux_m["gather"] == "take" else 5e-2
    np.testing.assert_allclose(np.asarray(out_m), ref_m, rtol=tol, atol=tol)

    print("KERNEL_OK")
</pallas_src>

<mosaic_0001>
module attributes {stable_mosaic.version = 11 : i64} {
  func.func @_kernel_onehot(%arg0: i32, %arg1: i32, %arg2: memref<4xi32, #tpu.memory_space<smem>>, %arg3: memref<16x16xbf16, #tpu.memory_space<vmem>>, %arg4: memref<16x1xf32, #tpu.memory_space<vmem>>, %arg5: memref<1x16x32xf32, #tpu.memory_space<vmem>>, %arg6: memref<1x16x32xf32, #tpu.memory_space<vmem>>, %arg7: memref<1x16x32xf32, #tpu.memory_space<vmem>>) attributes {dimension_semantics = [#tpu.dimension_semantics<parallel>, #tpu.dimension_semantics<parallel>], iteration_bounds = array<i64: 4, 1>, scalar_prefetch = 1 : i64, scratch_operands = 0 : i64, tpu.core_type = #tpu.core_type<tc>, window_params = [{pipeline_mode = #tpu.pipeline_mode<synchronous>, transform_indices = @transform_0, window_bounds = array<i64: 16, 16>}, {pipeline_mode = #tpu.pipeline_mode<synchronous>, transform_indices = @transform_1, window_bounds = array<i64: 16, 1>}, {transform_indices = @transform_2, window_bounds = array<i64: 1, 16, 32>}, {transform_indices = @transform_3, window_bounds = array<i64: 1, 16, 32>}, {transform_indices = @transform_4, window_bounds = array<i64: 1, 16, 32>}]} {
    %c0 = arith.constant 0 : index
    %c0_0 = arith.constant 0 : index
    %0 = vector.load %arg4[%c0, %c0_0] : memref<16x1xf32, #tpu.memory_space<vmem>>, vector<16x1xf32>
    %c0_1 = arith.constant 0 : index
    %c0_2 = arith.constant 0 : index
    %c0_3 = arith.constant 0 : index
    %1 = vector.load %arg5[%c0_1, %c0_2, %c0_3] : memref<1x16x32xf32, #tpu.memory_space<vmem>>, vector<1x16x32xf32>
    %2 = vector.shape_cast %1 : vector<1x16x32xf32> to vector<16x32xf32>
    %3 = vector.broadcast %0 : vector<16x1xf32> to vector<16x32xf32>
    %4 = arith.mulf %3, %2 : vector<16x32xf32>
    %cst = arith.constant 1.000000e+00 : f32
    %5 = vector.broadcast %cst : f32 to vector<16x1xf32>
    %6 = arith.subf %5, %0 : vector<16x1xf32>
    %c0_4 = arith.constant 0 : index
    %c0_5 = arith.constant 0 : index
    %c0_6 = arith.constant 0 : index
    %7 = vector.load %arg6[%c0_4, %c0_5, %c0_6] : memref<1x16x32xf32, #tpu.memory_space<vmem>>, vector<1x16x32xf32>
    %8 = vector.shape_cast %7 : vector<1x16x32xf32> to vector<16x32xf32>
    %9 = vector.broadcast %6 : vector<16x1xf32> to vector<16x32xf32>
    %10 = arith.mulf %9, %8 : vector<16x32xf32>
    %11 = arith.addf %4, %10 : vector<16x32xf32>
    %c0_7 = arith.constant 0 : index
    %c0_8 = arith.constant 0 : index
    %12 = vector.load %arg3[%c0_7, %c0_8] : memref<16x16xbf16, #tpu.memory_space<vmem>>, vector<16x16xbf16>
    %13 = arith.truncf %11 : vector<16x32xf32> to vector<16x32xbf16>
    %cst_9 = arith.constant dense<0.000000e+00> : vector<16x32xf32>
    %14 = tpu.matmul %12, %13, %cst_9 {dimension_numbers = #tpu.dot_dimension_numbers<[1], [0], [0], [1], [0, 0, 1, 1], [], []>} : vector<16x16xbf16>, vector<16x32xbf16>, vector<16x32xf32> -> vector<16x32xf32>
    %15 = vector.shape_cast %14 : vector<16x32xf32> to vector<1x16x32xf32>
    %c0_10 = arith.constant 0 : index
    %c0_11 = arith.constant 0 : index
    %c0_12 = arith.constant 0 : index
    %16 = vector.load %arg7[%c0_10, %c0_11, %c0_12] : memref<1x16x32xf32, #tpu.memory_space<vmem>>, vector<1x16x32xf32>
    tpu.vector_store %arg7[%c0_10, %c0_11, %c0_12], %15 {strides = array<i32>} : memref<1x16x32xf32, #tpu.memory_space<vmem>>, vector<1x16x32xf32>,
    return
  }
  func.func @transform_0(%arg0: i32, %arg1: i32, %arg2: memref<4xi32, #tpu.memory_space<smem>>) -> (i32, i32) {
    %c0_i32 = arith.constant 0 : i32
    %c0_i32_0 = arith.constant 0 : i32
    %c0_i32_1 = arith.constant 0 : i32
    return %c0_i32, %c0_i32_0 : i32, i32
  }
  func.func @transform_1(%arg0: i32, %arg1: i32, %arg2: memref<4xi32, #tpu.memory_space<smem>>) -> (i32, i32) {
    %c0_i32 = arith.constant 0 : i32
    %c0_i32_0 = arith.constant 0 : i32
    %c0_i32_1 = arith.constant 0 : i32
    return %c0_i32, %c0_i32_0 : i32, i32
  }
  func.func @transform_2(%arg0: i32, %arg1: i32, %arg2: memref<4xi32, #tpu.memory_space<smem>>) -> (i32, i32, i32) {
    %c0_i32 = arith.constant 0 : i32
    %c0_i32_0 = arith.constant 0 : i32
    return %arg0, %c0_i32, %arg1 : i32, i32, i32
  }
  func.func @transform_3(%arg0: i32, %arg1: i32, %arg2: memref<4xi32, #tpu.memory_space<smem>>) -> (i32, i32, i32) {
    %0 = arith.index_cast %arg0 : i32 to index
    %1 = memref.load %arg2[%0] : memref<4xi32, #tpu.memory_space<smem>>
    %c0_i32 = arith.constant 0 : i32
    %c0_i32_0 = arith.constant 0 : i32
    return %1, %c0_i32, %arg1 : i32, i32, i32
  }
  func.func @transform_4(%arg0: i32, %arg1: i32, %arg2: memref<4xi32, #tpu.memory_space<smem>>) -> (i32, i32, i32) {
    %c0_i32 = arith.constant 0 : i32
    %c0_i32_0 = arith.constant 0 : i32
    return %arg0, %c0_i32, %arg1 : i32, i32, i32
  }
}

</mosaic_0001>

<bundles_post_ra>
// kernel: _run.1
= control target key start
LH: loop header
LB: loop body
LE: loop exit
PB: predicated region body
PF: predicated region fallthrough
CT: control target
= control target key end

     0   :  { %s1191_s0 = inlined_call_operand.vmem [shape: s32[4], index: 0, kind: input, shape index: {}]   ;;  %s1192_s1 = inlined_call_operand.vmem [shape: bf16[16,16], index: 1, kind: input, shape index: {}]   ;;  %s1193_s2 = inlined_call_operand.vmem [shape: f32[16,1], index: 2, kind: input, shape index: {}]   ;;  %s1194_s3 = inlined_call_operand.hbm [shape: f32[4,16,32], index: 3, kind: input, shape index: {}, may-alias: {3,4}]   ;;  %s1195_s4 = inlined_call_operand.hbm [shape: f32[4,16,32], index: 4, kind: input, shape index: {}, may-alias: {3,4}]   ;;  %s1196_s5 = inlined_call_operand.hbm [shape: f32[4,16,32], index: 5, kind: output, shape index: {}]  }
   0x1   :  { %1206 = sst [smem:[#allocation19_spill]] %s1194_s3  ;;  %s10_s20 = sshll.u32 %s1191_s0, 4  ;;  %s11_s20 = int_to_ptr.vmem [resolvable:$true] %s10_s20 }
   0x2   :  { %s641_s21 = scalar_lea.vmem %s11_s20, 16  ;;  %p646_p1 = scmp.lt.s32.totalorder %s11_s20, %s11_s20 }
   0x3   :  { %p642_p0 = scmp.ne.s32.totalorder %s11_s20, %s641_s21  ;;  %p647_p2 = scmp.lt.s32.totalorder %s641_s21, %s641_s21 }
   0x5   :  { %p648_p3 = por %p647_p2, %p646_p1 }
   0x7   :  { %p649_p4 = pnand %p648_p3, %p642_p0 }
   0x9   :  { %652 = shalt.err (!%p649_p4)  }
   0xa   :  { %s827_s22 = smov [#allocation3]  }
   0xb   :  { %13 = dma.vmem_to_smem %s11_s20, 16, %s827_s22, [#allocation2] }
   0xc   :  { %777 = dma.done.wait [#allocation2], 16 }
   0xd   :  { %778 = vsyncadd [#allocation2], 4294967280 }
   0xe   :  { %15 = sfence }
   0xf   :  { %16 = vsyncpa [#allocation5], 0 }
  0x10   :  { %18 = vsyncpa [#allocation5 + $0x1], 0 }
  0x11   :  { %19 = vsyncpa [#allocation8], 0 }
  0x12   :  { %21 = vsyncpa [#allocation8 + $0x1], 0 }
  0x13   :  { %22 = vsyncpa [#allocation6], 0 }
  0x14   :  { %24 = vsyncpa [#allocation6 + $0x1], 0  ;;  %s871_s0 = smov 0   ;;  %s873_s23 = smov 0  }
  0x15   :  { %s875_s24 = smov 0   ;;  %s877_s25 = smov 0  }
  0x16   :  { %s879_s26 = smov 0   ;;  %s881_s27 = smov 0  }
  0x17   :  { %s883_s28 = smov 0   ;;  %s885_s29 = smov 0  }
  0x18   :  { %s887_s30 = smov 0  }
  0x19 LB: > { %1207 = sst [smem:[#allocation16_spill]] %s821_s29  ;;  %s503_s6 = sadd.s32 4294967295, %s825_s30   ;;  %s825_s30 = sphi %s887_s30, %s30_s30   ;;  %s821_s29 = sphi %s885_s29, %s1233_s29   ;;  %s817_s28 = sphi %s883_s28, %s1232_s28   ;;  %s813_s27 = sphi %s881_s27, %s1239_s27   ;;  %s809_s26 = sphi %s879_s26, %s1238_s26   ;;  %s805_s25 = sphi %s877_s25, %s1237_s25   ;;  %s801_s24 = sphi %s875_s24, %s1236_s24   ;;  %s797_s23 = sphi %s873_s23, %s1235_s23   ;;  %s793_s0 = sphi %s871_s0, %s1234_s0  }
  0x1a   : > { %s504_s7 = sadd.s32 4294967294, %s825_s30   ;;  %s42_s8 = sadd.s32 1, %s821_s29 }
  0x1b   : > { %s93_s9 = sadd.s32 1, %s813_s27  ;;  %p44_p5 = scmp.ge.s32.totalorder %s42_s8, 4 }
  0x1c   : > { %p100_p6 = scmp.ne.s32.totalorder %s813_s27, %s809_s26  ;;  %p1199_p7 = scmp.eq.s32.totalorder %s825_s30, 0 }
  0x1d   : > { %p106_p8 = scmp.ne.s32.totalorder %s809_s26, %s805_s25  ;;  %s1241_s8 = smov (%p44_p5, %s42_s8), 0 }
  0x1e   : > { %1208 = sst [smem:[#allocation17_spill]] %s1241_s8  ;;  %p932_p9 = por %p1199_p7, %p100_p6 }
  0x1f   : > { %p936_p10 = scmp.eq.s32.totalorder %s503_s6, 0  ;;  %s88_s12 = ssub.s32 %s821_s29, %s1241_s8 }
  0x20   : > { %s943_s13 = sld [smem:[#allocation3 + %s821_s29]]  ;;  %p91_p11 = scmp.eq.s32.totalorder %s88_s12, 0 }
  0x21   : > { %p950_p12 = por %p936_p10, %p106_p8  ;;  %s955_s15 = sld [smem:[#allocation3 + %s1241_s8]] }
  0x22   : > { %p162_p13 = scmp.eq.s32.totalorder %s503_s6, 3  ;;  %p168_p1 = scmp.eq.s32.totalorder %s504_s7, 3 }
  0x23   : > { %s1211_s14 = scalar_select %p950_p12, 1, 0 }
  0x24   : > { %s958_s16 = scalar_select %p91_p11, %s813_s27, %s93_s9  }
  0x25   : > { %p963_p0 = por %p162_p13, %p100_p6  ;;  %p1198_p2 = scmp.lt.s32.totalorder %s825_s30, 4 }
  0x26   : > { %1212 = sst [smem:[#allocation18_spill]] %s958_s16  ;;  %p971_p3 = por %p168_p1, %p106_p8 }
  0x27   : > { %s1213_s17 = scalar_select %p963_p0, 1, 0 }
  0x28   : > { %s1214_s18 = scalar_select %p971_p3, 1, 0 }
  0x29   : > { %s194_s19 = sand.u32 1, %s813_s27   ;;  %s524_s21 = sshll.u32 %s821_s29, 8 }
  0x2a   : > { %s507_s20 = sshll.u32 %s194_s19, 4  ;;  %s1215_s3 = sld [smem:[#allocation19_spill]] }
  0x2b   : > { %s198_s9 = scalar_lea.vmem [#allocation4], %s507_s20  ;;  %p988_p4 = pnand %p1198_p2, %p932_p9 }
  0x2c   : > { %s206_s7 = sshll.u32 %s198_s9, 4  ;;  %s993_s22 = scalar_lea.sflag [#allocation5], %s194_s19  ;;  %s982_s7 = int_to_ptr.vmem [resolvable:$true] %s206_s7 }
  0x2d   : > { %p655_p8 = pneg %p988_p4 }
  0x30   : > { %s980_s6 = scalar_lea.hbm %s1215_s3, %s524_s21  ;;  %s658_s12 = scalar_lea.hbm %s1215_s3, 1024 }
  0x31   : > { %s653_s21 = scalar_lea.hbm %s980_s6, 256  ;;  %p659_p9 = scmp.lt.u32.totalorder %s980_s6, %s1215_s3 }
  0x32   : > { %p654_p6 = scmp.ne.s32.totalorder %s980_s6, %s653_s21  ;;  %p660_p1 = scmp.lt.u32.totalorder %s658_s12, %s653_s21 }
  0x33   : > { %p662_p7 = scmp.lt.u32.totalorder %s653_s21, %s980_s6 }
  0x34   : > { %p656_p11 = pnand %p655_p8, %p654_p6  ;;  %p661_p2 = por %p660_p1, %p659_p9 }
  0x36   : > { %p657_p13 = pneg %p656_p11  ;;  %p663_p5 = por %p662_p7, %p661_p2 }
  0x38   : > { %p664_p3 = pnand %p663_p5, %p657_p13 }
  0x3a   : > { %667 = shalt.err (!%p664_p3)
}
  0x3b   : > { %s668_s19 = scalar_lea.vmem %s982_s7, 256  ;;  %s828_s20 = smov [#allocation4]  }
  0x3c   : > { %p669_p6 = scmp.ne.s32.totalorder %s982_s7, %s668_s19  ;;  %s673_s10 = sshll.u32 %s828_s20, 4  ;;  %s674_s10 = int_to_ptr.vmem [resolvable:$false] %s673_s10 }
  0x3d   : > { %s675_s16 = scalar_lea.vmem %s674_s10, 512  ;;  %p676_p12 = scmp.lt.s32.totalorder %s982_s7, %s674_s10 }
  0x3e   : > { %p671_p11 = pnand %p669_p6, %p655_p8  ;;  %p677_p9 = scmp.lt.s32.totalorder %s675_s16, %s668_s19 }
  0x40   : > { %p672_p0 = pneg %p671_p11  ;;  %p678_p1 = por %p677_p9, %p676_p12 }
  0x42   : > { %p679_p7 = pnand %p678_p1, %p672_p0 }
  0x44   : > { %682 = shalt.err (!%p679_p7)
}
  0x45   : > { %s1202_s21 = smov 128   ;;  %s1203_s12 = smov 8  }
  0x46   : > { %546 = dma.hbm_to_vmem [thread:$0]  (!%p988_p4), %s980_s6, 256, %s982_s7, %s993_s22, %s1202_s21, %s1202_s21, %s1203_s12  }
  0x47   : > { %p237_p12 = scmp.lt.s32.totalorder %s825_s30, 5  ;;  %p1217_p0 = scmp.ge.s32.totalorder %s825_s30, 1 }
  0x48   : > { %s118_s19 = ssub.s32 %s943_s13, %s955_s15  ;;  %s123_s20 = sadd.s32 1, %s801_s24 }
  0x49   : > { %p1027_p2 = pnand %p1217_p0, %p237_p12  ;;  %p121_p3 = scmp.eq.s32.totalorder %s118_s19, 0 }
  0x4a   : > { %p130_p5 = scmp.ne.s32.totalorder %s801_s24, %s797_s23  ;;  %p136_p8 = scmp.ne.s32.totalorder %s797_s23, %s793_s0 }
  0x4b   : > { %s216_s10 = sand.u32 1, %s801_s24   ;;  %p1219_p13 = scmp.eq.s32.totalorder %s825_s30, 0 }
  0x4c   : > { %s1040_s8 = scalar_select %p121_p3, %s801_s24, %s123_s20  }
  0x4d   : > { %p132_p6 = por %p130_p5, %p1219_p13  ;;  %p1046_p4 = por %p136_p8, %p936_p10 }
  0x4e   : > { %s510_s7 = sshll.u32 %s216_s10, 4  ;;  %p1221_p11 = scmp.lt.s32.totalorder %s825_s30, 4 }
  0x4f   : > { %s1220_s6 = scalar_select %p1046_p4, 1, 0 }
  0x50   : > { %p1052_p9 = pnand %p1221_p11, %p132_p6  ;;  %p1223_p1 = pmov %p1221_p11 }
  0x51   : > { %s536_s13 = scalar_select %p132_p6, [#allocation3], [#allocation10] }
  0x52   : > { %s537_s0 = scalar_select %p132_p6, %s821_s29, 0 }
  0x53   : > { %s1243_s13 = smov (!%p1223_p1, %s536_s13), [#allocation11]  ;;  %p1224_p7 = pmov %p1223_p1 }
  0x54   : > { %s220_s11 = scalar_lea.vmem [#allocation7], %s510_s7  ;;  %s1068_s3 = scalar_lea.sflag [#allocation8], %s216_s10 }
  0x55   : > { %s1245_s0 = smov (!%p1224_p7, %s537_s0), 0  ;;  %s229_s16 = sshll.u32 %s220_s11, 4  ;;  %s1061_s16 = int_to_ptr.vmem [resolvable:$true] %s229_s16 }
  0x56   : > { %s221_s15 = sld [smem:[%s1243_s13 + %s1245_s0]]  ;;  %p685_p12 = pneg %p1052_p9 }
  0x57   : > { %s688_s21 = scalar_lea.hbm %s1195_s4, 1024 }
  0x5c   : > { %s525_s19 = sshll.u32 %s221_s15, 8 }
  0x5d   : > { %s1066_s12 = scalar_lea.hbm %s1195_s4, %s525_s19 }
  0x5e   : > { %s683_s29 = scalar_lea.hbm %s1066_s12, 256  ;;  %p689_p5 = scmp.lt.u32.totalorder %s1066_s12, %s1195_s4 }
  0x5f   : > { %p684_p10 = scmp.ne.s32.totalorder %s1066_s12, %s683_s29  ;;  %p690_p8 = scmp.lt.u32.totalorder %s688_s21, %s683_s29 }
  0x60   : > { %p692_p6 = scmp.lt.u32.totalorder %s683_s29, %s1066_s12 }
  0x61   : > { %p686_p0 = pnand %p685_p12, %p684_p10  ;;  %p691_p13 = por %p690_p8, %p689_p5 }
  0x63   : > { %p687_p3 = pneg %p686_p0  ;;  %p693_p11 = por %p692_p6, %p691_p13 }
  0x65   : > { %p694_p1 = pnand %p693_p11, %p687_p3 }
  0x67   : > { %697 = shalt.err (!%p694_p1)
}
  0x68   : > { %s698_s10 = scalar_lea.vmem %s1061_s16, 256  ;;  %s831_s11 = smov [#allocation7]  }
  0x69   : > { %p699_p7 = scmp.ne.s32.totalorder %s1061_s16, %s698_s10  ;;  %s703_s19 = sshll.u32 %s831_s11, 4  ;;  %s704_s19 = int_to_ptr.vmem [resolvable:$false] %s703_s19 }
  0x6a   : > { %s705_s20 = scalar_lea.vmem %s704_s19, 512  ;;  %p706_p4 = scmp.lt.s32.totalorder %s1061_s16, %s704_s19 }
  0x6b   : > { %p701_p10 = pnand %p699_p7, %p685_p12  ;;  %p707_p5 = scmp.lt.s32.totalorder %s705_s20, %s698_s10 }
  0x6d   : > { %p702_p0 = pneg %p701_p10  ;;  %p708_p8 = por %p707_p5, %p706_p4 }
  0x6f   : > { %p709_p13 = pnand %p708_p8, %p702_p0 }
  0x71   : > { %712 = shalt.err (!%p709_p13)
}
  0x72   : > { %s1225_s29 = smov 8   ;;  %s1226_s7 = smov 128  }
  0x73   : > { %551 = dma.hbm_to_vmem [thread:$0]  (!%p1052_p9), %s1066_s12, 256, %s1061_s16, %s1068_s3, %s1226_s7, %s1226_s7, %s1225_s29  }
  0x74   : > { %241 = sbr.rel (%p1027_p2) target bundleno = 501 (0x1f5), region = 36  ;;  %s1102_s13 = sand.u32 (!%p1027_p2), 1, %s809_s26  }
  0x75   : > { %s514_s21 = sshll.u32 (!%p1027_p2), %s1102_s13, 4  ;;  %s244_s0 = scalar_lea.sflag (!%p1027_p2), [#allocation5], %s1102_s13 }
  0x76   : > { %s247_s22 = scalar_lea.vmem (!%p1027_p2), [#allocation4], %s514_s21  ;;  %p1227_p4 = scmp.ne.s32.totalorder (!%p1027_p2), %s1211_s14, 0 }
  0x7b   : > { %780 = dma.done.wait (%p1227_p4), %s244_s0, 256  }
  0x7c   : > { %782 = vsyncadd (%p1227_p4), %s244_s0, 4294967040  ;;  %s252_s3 = sand.u32 1, %s797_s23   ;;  %p1228_p2 = scmp.ne.s32.totalorder %s1220_s6, 0 }
  0x7d   : > { %s515_s12 = sshll.u32 %s252_s3, 4  ;;  %s253_s9 = scalar_lea.sflag [#allocation8], %s252_s3 }
  0x7e   : > { %s256_s16 = scalar_lea.vmem [#allocation7], %s515_s12 }
  0x7f   : > { %784 = dma.done.wait (%p1228_p2), %s253_s9, 256  }
  0x80   : > { %786 = vsyncadd (%p1228_p2), %s253_s9, 4294967040  ;;  %v832_v0 = vmov 0   ;;  %v288_v1 = vld [vmem:[%s1193_s2] sm:$0xff]  ;;  %v289_v2 = vld [vmem:[%s1193_s2 + $0x8] sm:$0xff]  ;;  %v833_v5 = vmov 0.0   ;;  %vm834_vm0 = vmmov 0  }
  0x81   : > { %638 = vset.pattern.permute.xlu0 %v832_v0  ;;  %639 = vset.pattern.permute.xlu1 %v832_v0  ;;  %v304_v3 = vsub.f32 1.0, %v288_v1  ;;  %v305_v4 = vsub.f32 1.0, %v289_v2  ;;  %v290_v7 = vld [vmem:[%s247_s22] sm:$0xff]  ;;  %v291_v10 = vld [vmem:[%s247_s22 + $0x8] sm:$0xff]  ;;  %vm330_vm1 = vcmask 130048   ;;  %s285_s20 = scalar_lea.vmem [#allocation9], %s514_s21 }
  0x82   : > { %294 = vperm.xlu0 %638, %v288_v1   ;;  %529 = vmatprep.subr.bf16.mxu0 %v833_v5  ;;  %v306_v8 = vld [vmem:[%s256_s16] sm:$0xff]  ;;  %v307_v12 = vld [vmem:[%s256_s16 + $0x8] sm:$0xff]  ;;  %s393_s29 = sshll.u32 %s285_s20, 4  ;;  %s526_s7 = sshll.u32 %s817_s28, 8  ;;  %vm375_vm2 = vcmask 261120   ;;  %s1129_s29 = int_to_ptr.vmem [resolvable:$true] %s393_s29 }
  0x83   : > { %310 = vperm.xlu1 %639, %v304_v3   ;;  %531 = vmatprep.mubr.msk.bf16.mxu0 %vm834_vm0, %v833_v5  ;;  %v640_v21 = vld [vmem:[%s1192_s1] sm:$0xff]   ;;  %s1134_s3 = scalar_lea.hbm %s1196_s5, %s526_s7  ;;  %s379_s21 = scalar_lea.sflag [#allocation6], %s1102_s13 }
  0x84   : > { %s713_s12 = scalar_lea.vmem %s1129_s29, 256  ;;  %p1229_p12 = scmp.ne.s32.totalorder %s1213_s17, 0 }
  0x85   : > { %p714_p9 = scmp.ne.s32.totalorder %s1129_s29, %s713_s12  ;;  %s835_s28 = smov [#allocation9]  }
  0x86   : > { %299 = vperm.xlu0 %638, %v289_v2   ;;  %s717_s9 = sshll.u32 %s835_s28, 4  ;;  %s718_s9 = int_to_ptr.vmem [resolvable:$false] %s717_s9 }
  0x87   : > { %315 = vperm.xlu1 %639, %v305_v4   ;;  %p715_p3 = pnand %p714_p9, %p1229_p12  ;;  %s719_s16 = scalar_lea.vmem %s718_s9, 512 }
  0x88   : > { %p720_p11 = scmp.lt.s32.totalorder %s1129_s29, %s718_s9  ;;  %p721_p1 = scmp.lt.s32.totalorder %s719_s16, %s713_s12 }
  0x89   : > { %p716_p6 = pneg %p715_p3 }
  0x8a   : > { %p722_p7 = por %p721_p1, %p720_p11 }
  0x8c   : > { %p723_p10 = pnand %p722_p7, %p716_p6 }
 0x101   : > { %v295_v6 = vpop.permute.xlu0 %294 }
 0x102   : > { %v311_v9 = vpop.permute.xlu1 %310  ;;  %v302_v13 = vmul.f32 %v295_v6, %v290_v7 }
 0x103   : > { %v318_v14 = vmul.f32 %v311_v9, %v306_v8 }
 0x105   : > { %v300_v11 = vpop.permute.xlu0 %299  ;;  %v320_v18 = vadd.f32 %v318_v14, %v302_v13 }
 0x106   : > { %v316_v15 = vpop.permute.xlu1 %315  ;;  %v303_v16 = vmul.f32 %v300_v11, %v291_v10 }
 0x107   : > { %v319_v17 = vmul.f32 %v316_v15, %v307_v12 }
 0x109   : > { %v321_v19 = vadd.f32 %v319_v17, %v303_v16 }
 0x10b   : > { %v324_v20 = vpack.c.bf16 %v321_v19, %v320_v18 }
 0x10d   : > { %530 = vmatpush3.bf16.msra.mxu0 %v324_v20 }
 0x110   : > { %532 = vmatmul.mubr.msk.bf16.vlgmr.msra.gmra.mrb[0].mxu0 %vm330_vm1, %v640_v21 }
 0x1e3   : > { %v368_v22 = vpop.f32.mrb[0].mxu0 }
 0x1e4   : > { %376 = vst.msk [vmem:[%s285_s20] sm:$0xff] %vm375_vm2, %v368_v22  ;;  %v533_v23 = vpop.f32.mrb[1].mxu0 }
 0x1e5   : > { %v371_v24 = vpop.f32.mrb[2].mxu0 }
 0x1e6   : > { %377 = vst.msk [vmem:[%s285_s20 + $0x8] sm:$0xff] %vm375_vm2, %v371_v24  ;;  %v534_v25 = vpop.f32.mrb[3].mxu0 }
 0x1e7   : > { %726 = shalt.err (!%p723_p10)
}
 0x1e8   : > { %s727_s15 = scalar_lea.hbm %s1134_s3, 256  ;;  %s731_s11 = scalar_lea.hbm %s1196_s5, 1024 }
 0x1e9   : > { %p728_p0 = scmp.ne.s32.totalorder %s1134_s3, %s727_s15  ;;  %p732_p13 = scmp.lt.u32.totalorder %s1134_s3, %s1196_s5 }
 0x1ea   : > { %p733_p4 = scmp.lt.u32.totalorder %s731_s11, %s727_s15  ;;  %p735_p9 = scmp.lt.u32.totalorder %s727_s15, %s1134_s3 }
 0x1eb   : > { %p729_p5 = pnand %p728_p0, %p1229_p12 }
 0x1ec   : > { %p734_p2 = por %p733_p4, %p732_p13 }
 0x1ed   : > { %p730_p8 = pneg %p729_p5 }
 0x1ee   : > { %p736_p3 = por %p735_p9, %p734_p2 }
 0x1f0   : > { %p737_p6 = pnand %p736_p3, %p730_p8 }
 0x1f2   : > { %740 = shalt.err (!%p737_p6)
}
 0x1f3   : > { %s836_s20 = smov 128   ;;  %s837_s7 = smov 8  }
 0x1f4   : > { %541 = dma.vmem_to_hbm [thread:$0]  (%p1229_p12), %s1129_s29, 256, %s1134_s3, %s379_s21, %s836_s20, %s836_s20, %s837_s7  }
 0x1f5 PF: > { %p557_p11 = scmp.ge.s32.totalorder %s825_s30, 2  ;;  %s408_s0 = sand.u32 1, %s805_s25  }
 0x1f6   : > { %p1230_p1 = scmp.ne.s32.totalorder %s1214_s18, 0  ;;  %s409_s22 = scalar_lea.sflag [#allocation6], %s408_s0 }
 0x1f8   : > { %p553_p7 = pnand %p557_p11, %p1230_p1 }
 0x1fa   : > { %788 = dma.done.wait (!%p553_p7), %s409_s22, 256  }
 0x1fb   : > { %790 = vsyncadd (!%p553_p7), %s409_s22, 4294967040  ;;  %s30_s30 = sadd.s32 1, %s825_s30   ;;  %s1231_s17 = sld [smem:[#allocation18_spill]] }
 0x1fc   : > { %p27_p10 = scmp.ge.s32.totalorder %s30_s30, 6   ;;  %s1232_s28 = sld [smem:[#allocation16_spill]] }
 0x1fd   : > { %s1233_s29 = sld [smem:[#allocation17_spill]]  ;;  %s1234_s0 = smov %s797_s23 }
 0x1fe   : > { %s1235_s23 = smov %s801_s24  ;;  %s1236_s24 = smov %s1040_s8 }
 0x1ff   : > { %s1237_s25 = smov %s809_s26  ;;  %s1238_s26 = smov %s813_s27 }
 0x200   :  { %29 = sbr.rel (!%p27_p10) target bundleno = 25 (0x19), region = 94 }
 0x201   : > { %s1239_s27 = smov %s1231_s17 }
 0x207   :  { %414 = vsyncpa [#allocation5], 1 }
 0x208   :  { %416 = vsyncpa [#allocation5 + $0x1], 1 }
 0x209   :  { %417 = vsyncpa [#allocation8], 1 }
 0x20a   :  { %419 = vsyncpa [#allocation8 + $0x1], 1 }
 0x20b   :  { %420 = vsyncpa [#allocation6], 1 }
 0x20c   :  { %422 = vsyncpa [#allocation6 + $0x1], 1 }

</bundles_post_ra>
